<compile_context>
chip_gen: v7x
topology: tpu7x:2x2x1
jax: 0.10.0
libtpu: 0.0.40
codegen_flags: <defaults>
</compile_context>

<pallas_src>
import jax
import jax.numpy as jnp
import numpy as np
from jax import lax
from jax.experimental import pallas as pl
from jax.experimental.pallas import tpu as pltpu


def _flash_attn_kernel(scale_ref, q_ref, k_ref, v_ref, o_ref,
                       m_sc, l_sc, acc_sc):
    # scale_ref : (1, H, 1, 1) f32    -- per-head softmax logit scale
    # q_ref     : (1, H, tq, Hd) bf16    k_ref/v_ref : (1, H, tk, Hd) bf16
    # o_ref     : (1, H, tq, Hd) f32
    # m_sc/l_sc : (H, tq, 1) f32 VMEM scratch;  acc_sc : (H, tq, Hd) f32 scratch
    ki = pl.program_id(2)

    @pl.when(ki == 0)
    def _():
        m_sc[...] = jnp.full_like(m_sc, -jnp.inf)
        l_sc[...] = jnp.zeros_like(l_sc)
        acc_sc[...] = jnp.zeros_like(acc_sc)

    scale = scale_ref[0]                    # (H, 1, 1): 2*alpha / (q_fro * x_inf)
    q = q_ref[0]                            # (H, tq, Hd) bf16
    k = k_ref[0]                            # (H, tk, Hd) bf16
    v = v_ref[0]                            # (H, tk, Hd) bf16

    # sim tile = scale * (q . k^T), head-batched -- softmax-invariant terms dropped.
    s = lax.dot_general(q, k, (((2,), (2,)), ((0,), (0,))),
                        preferred_element_type=jnp.float32)        # (H, tq, tk)
    s = s * scale

    # Online softmax update (per head, per query row).
    m_prev = m_sc[...]
    m_new = jnp.maximum(m_prev, jnp.max(s, axis=-1, keepdims=True))
    corr = jnp.exp(m_prev - m_new)
    p = jnp.exp(s - m_new)                                          # (H, tq, tk)
    l_sc[...] = corr * l_sc[...] + jnp.sum(p, axis=-1, keepdims=True)
    acc_sc[...] = corr * acc_sc[...] + lax.dot_general(
        p.astype(v.dtype), v, (((2,), (1,)), ((0,), (0,))),
        preferred_element_type=jnp.float32)                         # (H, tq, Hd)
    m_sc[...] = m_new

    @pl.when(ki == pl.num_programs(2) - 1)
    def _():
        inv_l = pl.reciprocal(l_sc[...], approx=True)
        o_ref[0] = (acc_sc[...] * inv_l).astype(o_ref.dtype)


def _pick_tile(n):
    """Largest nice tile that divides n (whole-N for small sequences)."""
    for t in (512, 256, 128):
        if n % t == 0:
            return t
    return n


def lipshitz_attention_core(q, k, v, scale):
    """q, k, v: (B, H, N, Hd) bf16; scale: (B, H, 1, 1) f32 -> (B, H, N, Hd) f32."""
    B, H, N, Hd = q.shape
    tq = _pick_tile(N)
    tk = _pick_tile(N)

    return pl.pallas_call(
        _flash_attn_kernel,
        out_shape=jax.ShapeDtypeStruct((B, H, N, Hd), jnp.float32),
        grid_spec=pltpu.PrefetchScalarGridSpec(
            num_scalar_prefetch=0,
            grid=(B, N // tq, N // tk),
            in_specs=[
                pl.BlockSpec((1, H, 1, 1), lambda b, qi, ki: (b, 0, 0, 0)),
                pl.BlockSpec((1, H, tq, Hd), lambda b, qi, ki: (b, 0, qi, 0)),
                pl.BlockSpec((1, H, tk, Hd), lambda b, qi, ki: (b, 0, ki, 0)),
                pl.BlockSpec((1, H, tk, Hd), lambda b, qi, ki: (b, 0, ki, 0)),
            ],
            out_specs=pl.BlockSpec(
                (1, H, tq, Hd), lambda b, qi, ki: (b, 0, qi, 0)),
            scratch_shapes=[
                pltpu.VMEM((H, tq, 1), jnp.float32),    # running max m
                pltpu.VMEM((H, tq, 1), jnp.float32),    # running denom l
                pltpu.VMEM((H, tq, Hd), jnp.float32),   # running accumulator
            ]),
        compiler_params=pltpu.CompilerParams(
            dimension_semantics=("parallel", "parallel", "arbitrary")),
    )(scale, q, k, v)


def lipshitz_rs_attention_forward(x, params, *, alpha, n_heads):
    """Full module forward: qkv linear -> Pallas flash attention -> proj linear."""
    B, N, D = x.shape
    Hd = D // n_heads

    # qkv = nn.Linear(dim, 3*dim)(x)
    qkv = jnp.einsum("bnd,ed->bne", x, params["qkv_w"]) + params["qkv_b"]
    qkv = qkv.reshape(B, N, 3, n_heads, Hd)
    qkv = jnp.transpose(qkv, (2, 0, 3, 1, 4))            # (3, B, H, N, Hd)
    q, k, v = qkv[0], qkv[1], qkv[2]

    # Per-(B,H)/per-B normalizers computed ONCE here (not per-head in-kernel).
    q_fro = jnp.sqrt(jnp.sum(q * q, axis=(-2, -1)))              # (B, H)
    x_inf = jnp.max(jnp.sum(jnp.abs(x), axis=-2), axis=-1)       # (B,)
    # sim = -alpha*(q_row_2 - 2 qk + k_col_2)/(q_fro*x_inf)
    #     = (2*alpha/(q_fro*x_inf)) * qk + const(b,h)  -> const cancels in softmax.
    scale = (2.0 * float(alpha)) / (q_fro * x_inf[:, None])      # (B, H) f32
    scale = scale[:, :, None, None].astype(jnp.float32)          # (B, H, 1, 1)

    weighted = lipshitz_attention_core(
        q.astype(jnp.bfloat16), k.astype(jnp.bfloat16), v.astype(jnp.bfloat16),
        scale)                                                   # (B, H, N, Hd) f32
    weighted = jnp.transpose(weighted, (0, 2, 1, 3)).reshape(B, N, D)

    # proj = nn.Linear(dim, dim); attn_drop / proj_drop have p=0.0 -> identity.
    out = jnp.einsum("bnd,ed->bne", weighted, params["proj_w"]) + params["proj_b"]
    return out


def _reference_forward(x, params, *, alpha, n_heads):
    """Pure-JAX f32 reference (full original formula) for correctness checking."""
    B, N, D = x.shape
    Hd = D // n_heads
    qkv = jnp.einsum("bnd,ed->bne", x, params["qkv_w"]) + params["qkv_b"]
    qkv = qkv.reshape(B, N, 3, n_heads, Hd).transpose(2, 0, 3, 1, 4)
    q, k, v = qkv[0], qkv[1], qkv[2]
    q_row_2 = jnp.max(jnp.sum(jnp.abs(q), axis=-1), axis=-1) ** 2        # (B, H)
    k_col_2 = jnp.max(jnp.sum(jnp.abs(k), axis=-2), axis=-1) ** 2        # (B, H)
    q_fro = jnp.sqrt(jnp.sum(q * q, axis=(-2, -1)))                      # (B, H)
    x_inf = jnp.max(jnp.sum(jnp.abs(x), axis=-2), axis=-1)               # (B,)
    qk = jnp.einsum("bhnd,bhmd->bhnm", q, k)
    sim = -alpha * (q_row_2[..., None, None] - 2.0 * qk + k_col_2[..., None, None])
    sim = sim / (q_fro * x_inf[:, None])[..., None, None]
    attn = jax.nn.softmax(sim, axis=-1)
    weighted = jnp.einsum("bhnm,bhmd->bhnd", attn, v)
    weighted = jnp.transpose(weighted, (0, 2, 1, 3)).reshape(B, N, D)
    return jnp.einsum("bnd,ed->bne", weighted, params["proj_w"]) + params["proj_b"]


if __name__ == "__main__":
    # Small deterministic configuration.
    batch, n_tokens, dim, n_heads = 2, 8, 32, 4
    alpha = 1.5
    qkv_bias = True

    key = jax.random.PRNGKey(0)
    kx, kqw, kqb, kpw, kpb = jax.random.split(key, 5)

    x = jax.random.normal(kx, (batch, n_tokens, dim), dtype=jnp.float32)
    params = {
        "qkv_w": jax.random.normal(kqw, (3 * dim, dim), jnp.float32) * 0.05,
        "qkv_b": (jax.random.normal(kqb, (3 * dim,), jnp.float32) * 0.05
                  if qkv_bias else jnp.zeros((3 * dim,), jnp.float32)),
        "proj_w": jax.random.normal(kpw, (dim, dim), jnp.float32) * 0.05,
        "proj_b": jax.random.normal(kpb, (dim,), jnp.float32) * 0.05,
    }

    out = lipshitz_rs_attention_forward(x, params, alpha=alpha, n_heads=n_heads)
    out = jax.block_until_ready(out)

    ref = _reference_forward(x, params, alpha=alpha, n_heads=n_heads)
    # bf16 MXU matmuls vs. f32 reference -> loosen tolerance accordingly.
    np.testing.assert_allclose(np.asarray(out), np.asarray(ref),
                               rtol=2e-2, atol=2e-3)

    print("KERNEL_OK")
</pallas_src>

<mosaic_0001>
module attributes {stable_mosaic.version = 11 : i64} {
  func.func @_flash_attn_kernel(%arg0: i32, %arg1: i32, %arg2: i32, %arg3: memref<1x4x1x1xf32, #tpu.memory_space<vmem>>, %arg4: memref<1x4x8x8xbf16, #tpu.memory_space<vmem>>, %arg5: memref<1x4x8x8xbf16, #tpu.memory_space<vmem>>, %arg6: memref<1x4x8x8xbf16, #tpu.memory_space<vmem>>, %arg7: memref<1x4x8x8xf32, #tpu.memory_space<vmem>>, %arg8: memref<4x8x1xf32, #tpu.memory_space<vmem>>, %arg9: memref<4x8x1xf32, #tpu.memory_space<vmem>>, %arg10: memref<4x8x8xf32, #tpu.memory_space<vmem>>) attributes {dimension_semantics = [#tpu.dimension_semantics<parallel>, #tpu.dimension_semantics<parallel>, #tpu.dimension_semantics<arbitrary>], iteration_bounds = array<i64: 2, 1, 1>, scalar_prefetch = 0 : i64, scratch_operands = 3 : i64, tpu.core_type = #tpu.core_type<tc>, window_params = [{transform_indices = @transform_0, window_bounds = array<i64: 1, 4, 1, 1>}, {transform_indices = @transform_1, window_bounds = array<i64: 1, 4, 8, 8>}, {transform_indices = @transform_2, window_bounds = array<i64: 1, 4, 8, 8>}, {transform_indices = @transform_3, window_bounds = array<i64: 1, 4, 8, 8>}, {transform_indices = @transform_4, window_bounds = array<i64: 1, 4, 8, 8>}]} {
    %c0_i32 = arith.constant 0 : i32
    %0 = arith.cmpi eq, %arg2, %c0_i32 : i32
    %1 = arith.extui %0 : i1 to i32
    %c0_i32_0 = arith.constant 0 : i32
    %2 = arith.cmpi ne, %1, %c0_i32_0 : i32
    scf.if %2 {
      %cst_39 = arith.constant 0xFF800000 : f32
      %40 = vector.broadcast %cst_39 : f32 to vector<4x8x1xf32>
      %c0_40 = arith.constant 0 : index
      %c0_41 = arith.constant 0 : index
      %c0_42 = arith.constant 0 : index
      %41 = vector.load %arg8[%c0_40, %c0_41, %c0_42] : memref<4x8x1xf32, #tpu.memory_space<vmem>>, vector<4x8x1xf32>
      tpu.vector_store %arg8[%c0_40, %c0_41, %c0_42], %40 {strides = array<i32>} : memref<4x8x1xf32, #tpu.memory_space<vmem>>, vector<4x8x1xf32>,
      %cst_43 = arith.constant 0.000000e+00 : f32
      %42 = vector.broadcast %cst_43 : f32 to vector<4x8x1xf32>
      %c0_44 = arith.constant 0 : index
      %c0_45 = arith.constant 0 : index
      %c0_46 = arith.constant 0 : index
      %43 = vector.load %arg9[%c0_44, %c0_45, %c0_46] : memref<4x8x1xf32, #tpu.memory_space<vmem>>, vector<4x8x1xf32>
      tpu.vector_store %arg9[%c0_44, %c0_45, %c0_46], %42 {strides = array<i32>} : memref<4x8x1xf32, #tpu.memory_space<vmem>>, vector<4x8x1xf32>,
      %cst_47 = arith.constant 0.000000e+00 : f32
      %44 = vector.broadcast %cst_47 : f32 to vector<4x8x8xf32>
      %c0_48 = arith.constant 0 : index
      %c0_49 = arith.constant 0 : index
      %c0_50 = arith.constant 0 : index
      %45 = vector.load %arg10[%c0_48, %c0_49, %c0_50] : memref<4x8x8xf32, #tpu.memory_space<vmem>>, vector<4x8x8xf32>
      tpu.vector_store %arg10[%c0_48, %c0_49, %c0_50], %44 {strides = array<i32>} : memref<4x8x8xf32, #tpu.memory_space<vmem>>, vector<4x8x8xf32>,
    } else {
    }
    %c0 = arith.constant 0 : index
    %c0_1 = arith.constant 0 : index
    %c0_2 = arith.constant 0 : index
    %c0_3 = arith.constant 0 : index
    %3 = vector.load %arg3[%c0, %c0_1, %c0_2, %c0_3] : memref<1x4x1x1xf32, #tpu.memory_space<vmem>>, vector<1x4x1x1xf32>
    %4 = vector.shape_cast %3 : vector<1x4x1x1xf32> to vector<4x1x1xf32>
    %c0_4 = arith.constant 0 : index
    %c0_5 = arith.constant 0 : index
    %c0_6 = arith.constant 0 : index
    %c0_7 = arith.constant 0 : index
    %5 = vector.load %arg4[%c0_4, %c0_5, %c0_6, %c0_7] : memref<1x4x8x8xbf16, #tpu.memory_space<vmem>>, vector<1x4x8x8xbf16>
    %6 = vector.shape_cast %5 : vector<1x4x8x8xbf16> to vector<4x8x8xbf16>
    %c0_8 = arith.constant 0 : index
    %c0_9 = arith.constant 0 : index
    %c0_10 = arith.constant 0 : index
    %c0_11 = arith.constant 0 : index
    %7 = vector.load %arg5[%c0_8, %c0_9, %c0_10, %c0_11] : memref<1x4x8x8xbf16, #tpu.memory_space<vmem>>, vector<1x4x8x8xbf16>
    %8 = vector.shape_cast %7 : vector<1x4x8x8xbf16> to vector<4x8x8xbf16>
    %c0_12 = arith.constant 0 : index
    %c0_13 = arith.constant 0 : index
    %c0_14 = arith.constant 0 : index
    %c0_15 = arith.constant 0 : index
    %9 = vector.load %arg6[%c0_12, %c0_13, %c0_14, %c0_15] : memref<1x4x8x8xbf16, #tpu.memory_space<vmem>>, vector<1x4x8x8xbf16>
    %10 = vector.shape_cast %9 : vector<1x4x8x8xbf16> to vector<4x8x8xbf16>
    %cst = arith.constant dense<0.000000e+00> : vector<4x8x8xf32>
    %11 = tpu.matmul %6, %8, %cst {dimension_numbers = #tpu.dot_dimension_numbers<[2], [2], [1], [1], [0, 0, 0, 1, 1, 1], [0], [0]>} : vector<4x8x8xbf16>, vector<4x8x8xbf16>, vector<4x8x8xf32> -> vector<4x8x8xf32>
    %12 = vector.broadcast %4 : vector<4x1x1xf32> to vector<4x8x8xf32>
    %13 = arith.mulf %11, %12 : vector<4x8x8xf32>
    %c0_16 = arith.constant 0 : index
    %c0_17 = arith.constant 0 : index
    %c0_18 = arith.constant 0 : index
    %14 = vector.load %arg8[%c0_16, %c0_17, %c0_18] : memref<4x8x1xf32, #tpu.memory_space<vmem>>, vector<4x8x1xf32>
    %cst_19 = arith.constant dense<0xFF800000> : vector<4x8xf32>
    %15 = vector.multi_reduction <maximumf>, %13, %cst_19 [2] : vector<4x8x8xf32> to vector<4x8xf32>
    %16 = vector.shape_cast %15 : vector<4x8xf32> to vector<4x8x1xf32>
    %17 = arith.maximumf %14, %16 : vector<4x8x1xf32>
    %18 = arith.subf %14, %17 : vector<4x8x1xf32>
    %19 = math.exp %18 : vector<4x8x1xf32>
    %20 = vector.broadcast %17 : vector<4x8x1xf32> to vector<4x8x8xf32>
    %21 = arith.subf %13, %20 : vector<4x8x8xf32>
    %22 = math.exp %21 : vector<4x8x8xf32>
    %c0_20 = arith.constant 0 : index
    %c0_21 = arith.constant 0 : index
    %c0_22 = arith.constant 0 : index
    %23 = vector.load %arg9[%c0_20, %c0_21, %c0_22] : memref<4x8x1xf32, #tpu.memory_space<vmem>>, vector<4x8x1xf32>
    %24 = arith.mulf %19, %23 : vector<4x8x1xf32>
    %cst_23 = arith.constant dense<0.000000e+00> : vector<4x8xf32>
    %25 = vector.multi_reduction <add>, %22, %cst_23 [2] : vector<4x8x8xf32> to vector<4x8xf32>
    %26 = vector.shape_cast %25 : vector<4x8xf32> to vector<4x8x1xf32>
    %27 = arith.addf %24, %26 : vector<4x8x1xf32>
    %c0_24 = arith.constant 0 : index
    %c0_25 = arith.constant 0 : index
    %c0_26 = arith.constant 0 : index
    %28 = vector.load %arg9[%c0_24, %c0_25, %c0_26] : memref<4x8x1xf32, #tpu.memory_space<vmem>>, vector<4x8x1xf32>
    tpu.vector_store %arg9[%c0_24, %c0_25, %c0_26], %27 {strides = array<i32>} : memref<4x8x1xf32, #tpu.memory_space<vmem>>, vector<4x8x1xf32>,
    %c0_27 = arith.constant 0 : index
    %c0_28 = arith.constant 0 : index
    %c0_29 = arith.constant 0 : index
    %29 = vector.load %arg10[%c0_27, %c0_28, %c0_29] : memref<4x8x8xf32, #tpu.memory_space<vmem>>, vector<4x8x8xf32>
    %30 = vector.broadcast %19 : vector<4x8x1xf32> to vector<4x8x8xf32>
    %31 = arith.mulf %30, %29 : vector<4x8x8xf32>
    %32 = arith.truncf %22 : vector<4x8x8xf32> to vector<4x8x8xbf16>
    %cst_30 = arith.constant dense<0.000000e+00> : vector<4x8x8xf32>
    %33 = tpu.matmul %32, %10, %cst_30 {dimension_numbers = #tpu.dot_dimension_numbers<[2], [1], [1], [2], [0, 0, 0, 1, 1, 2], [0], [0]>} : vector<4x8x8xbf16>, vector<4x8x8xbf16>, vector<4x8x8xf32> -> vector<4x8x8xf32>
    %34 = arith.addf %31, %33 : vector<4x8x8xf32>
    %c0_31 = arith.constant 0 : index
    %c0_32 = arith.constant 0 : index
    %c0_33 = arith.constant 0 : index
    %35 = vector.load %arg10[%c0_31, %c0_32, %c0_33] : memref<4x8x8xf32, #tpu.memory_space<vmem>>, vector<4x8x8xf32>
    tpu.vector_store %arg10[%c0_31, %c0_32, %c0_33], %34 {strides = array<i32>} : memref<4x8x8xf32, #tpu.memory_space<vmem>>, vector<4x8x8xf32>,
    %c0_34 = arith.constant 0 : index
    %c0_35 = arith.constant 0 : index
    %c0_36 = arith.constant 0 : index
    %36 = vector.load %arg8[%c0_34, %c0_35, %c0_36] : memref<4x8x1xf32, #tpu.memory_space<vmem>>, vector<4x8x1xf32>
    tpu.vector_store %arg8[%c0_34, %c0_35, %c0_36], %17 {strides = array<i32>} : memref<4x8x1xf32, #tpu.memory_space<vmem>>, vector<4x8x1xf32>,
    %c0_i32_37 = arith.constant 0 : i32
    %37 = arith.cmpi eq, %arg2, %c0_i32_37 : i32
    %38 = arith.extui %37 : i1 to i32
    %c0_i32_38 = arith.constant 0 : i32
    %39 = arith.cmpi ne, %38, %c0_i32_38 : i32
    scf.if %39 {
      %c0_39 = arith.constant 0 : index
      %c0_40 = arith.constant 0 : index
      %c0_41 = arith.constant 0 : index
      %40 = vector.load %arg9[%c0_39, %c0_40, %c0_41] : memref<4x8x1xf32, #tpu.memory_space<vmem>>, vector<4x8x1xf32>
      %41 = tpu.reciprocal %40 {approx = true} : vector<4x8x1xf32> -> vector<4x8x1xf32>
      %c0_42 = arith.constant 0 : index
      %c0_43 = arith.constant 0 : index
      %c0_44 = arith.constant 0 : index
      %42 = vector.load %arg10[%c0_42, %c0_43, %c0_44] : memref<4x8x8xf32, #tpu.memory_space<vmem>>, vector<4x8x8xf32>
      %43 = vector.broadcast %41 : vector<4x8x1xf32> to vector<4x8x8xf32>
      %44 = arith.mulf %42, %43 : vector<4x8x8xf32>
      %c0_45 = arith.constant 0 : index
      %c0_46 = arith.constant 0 : index
      %c0_47 = arith.constant 0 : index
      %c0_48 = arith.constant 0 : index
      %45 = vector.load %arg7[%c0_45, %c0_46, %c0_47, %c0_48] : memref<1x4x8x8xf32, #tpu.memory_space<vmem>>, vector<1x4x8x8xf32>
      %46 = vector.shape_cast %45 : vector<1x4x8x8xf32> to vector<4x8x8xf32>
      %47 = vector.shape_cast %44 : vector<4x8x8xf32> to vector<1x4x8x8xf32>
      tpu.vector_store %arg7[%c0_45, %c0_46, %c0_47, %c0_48], %47 {strides = array<i32>} : memref<1x4x8x8xf32, #tpu.memory_space<vmem>>, vector<1x4x8x8xf32>,
    } else {
    }
    return
  }
  func.func @transform_0(%arg0: i32, %arg1: i32, %arg2: i32) -> (i32, i32, i32, i32) {
    %c0_i32 = arith.constant 0 : i32
    %c0_i32_0 = arith.constant 0 : i32
    %c0_i32_1 = arith.constant 0 : i32
    %c0_i32_2 = arith.constant 0 : i32
    return %arg0, %c0_i32, %c0_i32_0, %c0_i32_1 : i32, i32, i32, i32
  }
  func.func @transform_1(%arg0: i32, %arg1: i32, %arg2: i32) -> (i32, i32, i32, i32) {
    %c0_i32 = arith.constant 0 : i32
    %c0_i32_0 = arith.constant 0 : i32
    %c0_i32_1 = arith.constant 0 : i32
    return %arg0, %c0_i32, %arg1, %c0_i32_0 : i32, i32, i32, i32
  }
  func.func @transform_2(%arg0: i32, %arg1: i32, %arg2: i32) -> (i32, i32, i32, i32) {
    %c0_i32 = arith.constant 0 : i32
    %c0_i32_0 = arith.constant 0 : i32
    %c0_i32_1 = arith.constant 0 : i32
    return %arg0, %c0_i32, %arg2, %c0_i32_0 : i32, i32, i32, i32
  }
  func.func @transform_3(%arg0: i32, %arg1: i32, %arg2: i32) -> (i32, i32, i32, i32) {
    %c0_i32 = arith.constant 0 : i32
    %c0_i32_0 = arith.constant 0 : i32
    %c0_i32_1 = arith.constant 0 : i32
    return %arg0, %c0_i32, %arg2, %c0_i32_0 : i32, i32, i32, i32
  }
  func.func @transform_4(%arg0: i32, %arg1: i32, %arg2: i32) -> (i32, i32, i32, i32) {
    %c0_i32 = arith.constant 0 : i32
    %c0_i32_0 = arith.constant 0 : i32
    %c0_i32_1 = arith.constant 0 : i32
    return %arg0, %c0_i32, %arg1, %c0_i32_0 : i32, i32, i32, i32
  }
}

</mosaic_0001>

<bundles_post_ra>
// kernel: tpu_custom_call.1
= control target key start
LH: loop header
LB: loop body
LE: loop exit
PB: predicated region body
PF: predicated region fallthrough
CT: control target
= control target key end

     0   :  { %s1953_s0 = inlined_call_operand.vmem [shape: f32[2,4,1,1], index: 0, kind: input, shape index: {}]   ;;  %s1954_s1 = inlined_call_operand.hbm [shape: bf16[2,4,8,8], index: 1, kind: input, shape index: {}]   ;;  %s1955_s2 = inlined_call_operand.hbm [shape: bf16[2,4,8,8], index: 2, kind: input, shape index: {}]   ;;  %s1956_s3 = inlined_call_operand.hbm [shape: bf16[2,4,8,8], index: 3, kind: input, shape index: {}]   ;;  %s1957_s4 = inlined_call_operand.hbm [shape: f32[2,4,8,8], index: 4, kind: output, shape index: {}]  }
   0x1   :  { %1969 = sst [smem:[#allocation19_spill]] %s1955_s2 }
   0x2   :  { %9 = vsyncpa [#allocation6], 0 }
   0x3   :  { %11 = vsyncpa [#allocation6 + $0x1], 0 }
   0x4   :  { %12 = vsyncpa [#allocation9], 0 }
   0x5   :  { %14 = vsyncpa [#allocation9 + $0x1], 0 }
   0x6   :  { %15 = vsyncpa [#allocation7], 0 }
   0x7   :  { %17 = vsyncpa [#allocation7 + $0x1], 0  ;;  %s1552_s15 = smov 0   ;;  %s1554_s16 = smov 0  }
   0x8   :  { %s1556_s17 = smov 0   ;;  %s1558_s18 = smov 0  }
   0x9   :  { %s1560_s19 = smov 0   ;;  %s1562_s20 = smov 0  }
   0xa LB: > { %1970 = sst [smem:[#allocation15_spill]] %s1509_s19  ;;  %s1583_s21 = sadd.s32 4294967295, %s1513_s20   ;;  %s1513_s20 = sphi %s1562_s20, %s23_s20   ;;  %s1509_s19 = sphi %s1560_s19, %s1995_s19   ;;  %s1505_s18 = sphi %s1558_s18, %s1994_s18   ;;  %s1501_s17 = sphi %s1556_s17, %s1998_s17   ;;  %s1497_s16 = sphi %s1554_s16, %s1997_s16   ;;  %s1493_s15 = sphi %s1552_s15, %s1996_s15  }
   0xb   : > { %1971 = sst [smem:[#allocation16_spill]] %s1513_s20  ;;  %s1128_s22 = sadd.s32 4294967294, %s1513_s20  }
   0xc   : > { %s42_s23 = sadd.s32 1, %s1509_s19  ;;  %s77_s24 = sadd.s32 1, %s1501_s17 }
   0xd   : > { %p44_p0 = scmp.ge.s32.totalorder %s42_s23, 2  ;;  %p84_p1 = scmp.ne.s32.totalorder %s1501_s17, %s1497_s16 }
   0xe   : > { %p85_p2 = scmp.eq.s32.totalorder %s1513_s20, 0  ;;  %p90_p3 = scmp.ne.s32.totalorder %s1497_s16, %s1493_s15 }
   0xf   : > { %s2000_s23 = smov (%p44_p0, %s42_s23), 0  ;;  %p91_p5 = scmp.eq.s32.totalorder %s1583_s21, 0 }
  0x10   : > { %1972 = sst [smem:[#allocation17_spill]] %s2000_s23  ;;  %p1595_p4 = por %p85_p2, %p84_p1 }
  0x11   : > { %s72_s26 = ssub.s32 %s1509_s19, %s2000_s23  ;;  %p172_p6 = scmp.eq.s32.totalorder %s1583_s21, 1 }
  0x12   : > { %p75_p7 = scmp.eq.s32.totalorder %s72_s26, 0  ;;  %p1603_p8 = por %p91_p5, %p90_p3 }
  0x13   : > { %p1607_p9 = por %p172_p6, %p84_p1  ;;  %p178_p10 = scmp.eq.s32.totalorder %s1128_s22, 1 }
  0x14   : > { %s1974_s27 = scalar_select %p1603_p8, 1, 0 }
  0x15   : > { %s1975_s28 = scalar_select %p1607_p9, 1, 0 }
  0x16   : > { %s1612_s29 = scalar_select %p75_p7, %s1501_s17, %s77_s24  }
  0x17   : > { %p1614_p11 = por %p178_p10, %p90_p3  ;;  %p1253_p13 = scmp.lt.s32.totalorder %s1513_s20, 2 }
  0x18   : > { %1976 = sst [smem:[#allocation18_spill]] %s1612_s29  ;;  %s1958_s5 = sand.u32 1, %s1501_s17  }
  0x19   : > { %s1977_s30 = scalar_select %p1614_p11, 1, 0 }
  0x1a   : > { %s1623_s6 = sshll.u32 %s1958_s5, 4  ;;  %s1626_s7 = sshll.u32 %s1509_s19, 8 }
  0x1b   : > { %p1630_p0 = pnand %p1253_p13, %p1595_p4  ;;  %s227_s9 = sand.u32 1, %s1513_s20  }
  0x1c   : > { %s1979_s2 = sld [smem:[#allocation19_spill]]  ;;  %s231_s13 = scalar_lea.vmem [#allocation8], %s1623_s6 }
  0x1d   : > { %s239_s14 = sshll.u32 %s231_s13, 4  ;;  %s1646_s22 = scalar_lea.sflag [#allocation9], %s227_s9  ;;  %s1643_s14 = int_to_ptr.vmem [resolvable:$true] %s239_s14 }
  0x1e   : > { %p1652_p4 = pneg %p1630_p0 }
  0x22   : > { %s1639_s12 = scalar_lea.hbm %s1979_s2, %s1626_s7  ;;  %s1342_s11 = scalar_lea.hbm %s1979_s2, 512 }
  0x23   : > { %s1337_s24 = scalar_lea.hbm %s1639_s12, 256  ;;  %p1343_p7 = scmp.lt.u32.totalorder %s1639_s12, %s1979_s2 }
  0x24   : > { %p1338_p3 = scmp.ne.s32.totalorder %s1639_s12, %s1337_s24  ;;  %p1344_p10 = scmp.lt.u32.totalorder %s1342_s11, %s1337_s24 }
  0x25   : > { %p1346_p12 = scmp.lt.u32.totalorder %s1337_s24, %s1639_s12 }
  0x26   : > { %p1340_p5 = pnand %p1652_p4, %p1338_p3  ;;  %p1345_p13 = por %p1344_p10, %p1343_p7 }
  0x28   : > { %p1341_p6 = pneg %p1340_p5  ;;  %p1347_p1 = por %p1346_p12, %p1345_p13 }
  0x2a   : > { %p1348_p2 = pnand %p1347_p1, %p1341_p6 }
  0x2c   : > { %1351 = shalt.err (!%p1348_p2)
}
  0x2d   : > { %s1352_s9 = scalar_lea.vmem %s1643_s14, 256  ;;  %s1515_s26 = smov [#allocation8]  }
  0x2e   : > { %p1353_p3 = scmp.ne.s32.totalorder %s1643_s14, %s1352_s9  ;;  %s1357_s10 = sshll.u32 %s1515_s26, 4  ;;  %s1358_s10 = int_to_ptr.vmem [resolvable:$false] %s1357_s10 }
  0x2f   : > { %s1359_s5 = scalar_lea.vmem %s1358_s10, 512  ;;  %p1360_p9 = scmp.lt.s32.totalorder %s1643_s14, %s1358_s10 }
  0x30   : > { %p1355_p5 = pnand %p1353_p3, %p1652_p4  ;;  %p1361_p8 = scmp.lt.s32.totalorder %s1359_s5, %s1352_s9 }
  0x32   : > { %p1356_p11 = pneg %p1355_p5  ;;  %p1362_p7 = por %p1361_p8, %p1360_p9 }
  0x34   : > { %p1363_p10 = pnand %p1362_p7, %p1356_p11 }
  0x36   : > { %1366 = shalt.err (!%p1363_p10)
}
  0x37   : > { %s1961_s24 = smov 64   ;;  %s1963_s11 = smov 4  }
  0x38   : > { %1245 = dma.hbm_to_vmem [thread:$0]  (!%p1630_p0), %s1639_s12, 256, %s1643_s14, %s1646_s22, %s1961_s24, %s1961_s24, %s1963_s11  }
  0x39   : > { %p1981_p8 = scmp.lt.s32.totalorder %s1513_s20, 3  ;;  %p1982_p9 = scmp.ge.s32.totalorder %s1513_s20, 1 }
  0x3a   : > { %s1691_s10 = scalar_lea.hbm %s1954_s1, %s1626_s7  ;;  %s209_s5 = scalar_lea.vmem [#allocation5], %s1623_s6 }
  0x3b   : > { %p1683_p11 = pnand %p1982_p9, %p1981_p8  ;;  %s217_s2 = sshll.u32 %s209_s5, 4  ;;  %s1694_s2 = int_to_ptr.vmem [resolvable:$true] %s217_s2 }
  0x3c   : > { %s1700_s24 = scalar_lea.hbm %s1956_s3, %s1626_s7  ;;  %s1984_s11 = sand.u32 1, %s1501_s17  }
  0x3d   : > { %s1983_s13 = scalar_select %p1683_p11, 1, 0 }
  0x3e   : > { %s1704_s23 = scalar_lea.sflag [#allocation6], %s1984_s11  ;;  %s1367_s19 = scalar_lea.hbm %s1691_s10, 256 }
  0x3f   : > { %p1368_p12 = scmp.ne.s32.totalorder %s1691_s10, %s1367_s19  ;;  %s1372_s29 = scalar_lea.hbm %s1954_s1, 512 }
  0x40   : > { %p1373_p6 = scmp.lt.u32.totalorder %s1691_s10, %s1954_s1  ;;  %p1374_p13 = scmp.lt.u32.totalorder %s1372_s29, %s1367_s19 }
  0x41   : > { %p1370_p1 = pnand %p1368_p12, %p1652_p4  ;;  %p1376_p5 = scmp.lt.u32.totalorder %s1367_s19, %s1691_s10 }
  0x42   : > { %p1375_p3 = por %p1374_p13, %p1373_p6 }
  0x43   : > { %p1371_p2 = pneg %p1370_p1 }
  0x44   : > { %p1377_p7 = por %p1376_p5, %p1375_p3 }
  0x46   : > { %p1378_p10 = pnand %p1377_p7, %p1371_p2 }
  0x48   : > { %1381 = shalt.err (!%p1378_p10)
}
  0x49   : > { %s1382_s7 = scalar_lea.vmem %s1694_s2, 256  ;;  %s1518_s11 = smov [#allocation5]  }
  0x4a   : > { %p1383_p8 = scmp.ne.s32.totalorder %s1694_s2, %s1382_s7  ;;  %s1387_s12 = sshll.u32 %s1518_s11, 4  ;;  %s1388_s12 = int_to_ptr.vmem [resolvable:$false] %s1387_s12 }
  0x4b   : > { %s1389_s20 = scalar_lea.vmem %s1388_s12, 512  ;;  %p1390_p1 = scmp.lt.s32.totalorder %s1694_s2, %s1388_s12 }
  0x4c   : > { %p1385_p9 = pnand %p1383_p8, %p1652_p4  ;;  %p1391_p11 = scmp.lt.s32.totalorder %s1389_s20, %s1382_s7 }
  0x4e   : > { %p1386_p12 = pneg %p1385_p9  ;;  %p1392_p6 = por %p1391_p11, %p1390_p1 }
  0x50   : > { %p1393_p13 = pnand %p1392_p6, %p1386_p12 }
  0x52   : > { %1396 = shalt.err (!%p1393_p13)
}
  0x53   : > { %s1985_s19 = smov 4   ;;  %s1986_s29 = smov 64  }
  0x54   : > { %1242 = dma.hbm_to_vmem [thread:$0]  (!%p1630_p0), %s1691_s10, 256, %s1694_s2, %s1704_s23, %s1986_s29, %s1986_s29, %s1985_s19  }
  0x55   : > { %s253_s14 = scalar_lea.vmem [#allocation10], %s1623_s6  ;;  %s1397_s26 = scalar_lea.hbm %s1700_s24, 256 }
  0x56   : > { %s261_s9 = sshll.u32 %s253_s14, 4  ;;  %p1398_p11 = scmp.ne.s32.totalorder %s1700_s24, %s1397_s26  ;;  %s1732_s9 = int_to_ptr.vmem [resolvable:$true] %s261_s9 }
  0x57   : > { %s1402_s11 = scalar_lea.hbm %s1956_s3, 512  ;;  %p1403_p5 = scmp.lt.u32.totalorder %s1700_s24, %s1956_s3 }
  0x58   : > { %p1400_p2 = pnand %p1398_p11, %p1652_p4  ;;  %p1404_p7 = scmp.lt.u32.totalorder %s1402_s11, %s1397_s26 }
  0x59   : > { %p1406_p8 = scmp.lt.u32.totalorder %s1397_s26, %s1700_s24 }
  0x5a   : > { %p1401_p3 = pneg %p1400_p2  ;;  %p1405_p10 = por %p1404_p7, %p1403_p5 }
  0x5c   : > { %p1407_p9 = por %p1406_p8, %p1405_p10 }
  0x5e   : > { %p1408_p12 = pnand %p1407_p9, %p1401_p3 }
  0x60   : > { %1411 = shalt.err (!%p1408_p12)
}
  0x61   : > { %s1412_s2 = scalar_lea.vmem %s1732_s9, 256  ;;  %s1519_s23 = smov [#allocation10]  }
  0x62   : > { %p1413_p1 = scmp.ne.s32.totalorder %s1732_s9, %s1412_s2  ;;  %s1417_s6 = sshll.u32 %s1519_s23, 4  ;;  %s1418_s6 = int_to_ptr.vmem [resolvable:$false] %s1417_s6 }
  0x63   : > { %s1419_s10 = scalar_lea.vmem %s1418_s6, 512  ;;  %p1420_p11 = scmp.lt.s32.totalorder %s1732_s9, %s1418_s6 }
  0x64   : > { %p1415_p6 = pnand %p1413_p1, %p1652_p4  ;;  %p1421_p2 = scmp.lt.s32.totalorder %s1419_s10, %s1412_s2 }
  0x66   : > { %p1416_p13 = pneg %p1415_p6  ;;  %p1422_p5 = por %p1421_p2, %p1420_p11 }
  0x68   : > { %p1423_p7 = pnand %p1422_p5, %p1416_p13 }
  0x6a   : > { %1426 = shalt.err (!%p1423_p7)
}
  0x6b   : > { %1248 = dma.hbm_to_vmem [thread:$0]  (!%p1630_p0), %s1700_s24, 256, %s1732_s9, %s1646_s22, %s1986_s29, %s1986_s29, %s1985_s19  }
  0x6c   : > { %p1987_p4 = scmp.ne.s32.totalorder %s1983_s13, 0 }
  0x6d   : > { %s1762_s25 = sand.u32 (!%p1987_p4), 1, %s1497_s16   ;;  %p1988_p3 = scmp.ne.s32.totalorder (!%p1987_p4), %s1974_s27, 0 }
  0x6e   : > { %273 = sbr.rel (%p1987_p4) target bundleno = 955 (0x3bb), region = 36  ;;  %s1765_s14 = sshll.u32 (!%p1987_p4), %s1762_s25, 4 }
  0x6f   : > { %s276_s8 = scalar_lea.sflag (!%p1987_p4), [#allocation6], %s1762_s25  ;;  %s1769_s26 = scalar_lea.vmem (!%p1987_p4), [#allocation5], %s1765_s14 }
  0x75   : > { %1480 = dma.done.wait (%p1988_p3), %s276_s8, 256  }
  0x76   : > { %1482 = vsyncadd (%p1988_p3), %s276_s8, 4294967040  ;;  %s284_s22 = sand.u32 1, %s1583_s21   ;;  %s1777_s13 = scalar_lea.vmem [#allocation8], %s1765_s14 }
  0x77   : > { %s285_s24 = scalar_lea.sflag [#allocation9], %s284_s22 }
  0x78   : > { %1484 = dma.done.wait (%p1988_p3), %s285_s24, 512  }
  0x79   : > { %1486 = vsyncadd (%p1988_p3), %s285_s24, 4294966784  ;;  %vm354_vm0 = vcmask 64512   ;;  %p336_p0 = scmp.lt.s32.totalorder %s1505_s18, 1  ;;  %v1520_v0 = vmov 0.0   ;;  %vm1521_vm1 = vmmov 0   ;;  %v1522_v1 = vmov 0  }
  0x7a   : > { %1183 = vmatprep.subr.bf16.mxu0 %v1520_v0  ;;  %1189 = vmatprep.subr.bf16.mxu1 %v1520_v0  ;;  %355 = vst.msk [vmem:[#allocation4] sm:$0xff] %vm354_vm0, %v1520_v0  ;;  %356 = vst.msk [vmem:[#allocation4 + $0x8] sm:$0xff] %vm354_vm0, %v1520_v0  ;;  %v367_v2 = vld [vmem:[%s1777_s13] sm:$0xf]  ;;  %v368_v3 = vld [vmem:[%s1777_s13 + $0x4] sm:$0xf] }
  0x7b   : > { %357 = vst.msk [vmem:[#allocation4 + $0x10] sm:$0xff] %vm354_vm0, %v1520_v0  ;;  %358 = vst.msk [vmem:[#allocation4 + $0x18] sm:$0xff] %vm354_vm0, %v1520_v0  ;;  %1185 = vmatprep.mubr.msk.bf16.mxu0 %vm1521_vm1, %v1520_v0  ;;  %1191 = vmatprep.mubr.msk.bf16.mxu1 %vm1521_vm1, %v1520_v0  ;;  %s337_s21 = scalar_select %p336_p0, %s1505_s18, 1  ;;  %v380_v4 = vsel %vm354_vm0, %v367_v2, 0  ;;  %v426_v5 = vsel %vm354_vm0, %v368_v3, 0  ;;  %vm345_vm2 = vcmask 7168  }
  0x7c   : > { %1311 = vset.pattern.permute.xlu0 %v1522_v1  ;;  %1312 = vset.pattern.permute.xlu1 %v1522_v1  ;;  %v369_v7 = vld [vmem:[%s1777_s13 + $0x8] sm:$0xf]  ;;  %v370_v8 = vld [vmem:[%s1777_s13 + $0xc] sm:$0xf]  ;;  %v363_v11 = vld [vmem:[%s1769_s26] sm:$0xf] }
  0x7d   : > { %s1145_s27 = sshll.u32 %s337_s21, 2  ;;  %1184 = vmatpush3.bf16.xpose.msra.mxu0 %v380_v4  ;;  %1190 = vmatpush3.bf16.xpose.msra.mxu1 %v426_v5  ;;  %v364_v12 = vld [vmem:[%s1769_s26 + $0x4] sm:$0xf]  ;;  %v472_v13 = vsel %vm354_vm0, %v369_v7, 0  ;;  %v518_v14 = vsel %vm354_vm0, %v370_v8, 0  ;;  %v1523_v18 = vmov -inf  }
  0x7e   : > { %s339_s9 = scalar_lea.vmem %s1953_s0, %s1145_s27  ;;  %1195 = vmatprep.subr.bf16.mxu0 %v1520_v0  ;;  %1201 = vmatprep.subr.bf16.mxu1 %v1520_v0  ;;  %v365_v16 = vld [vmem:[%s1769_s26 + $0x8] sm:$0xf]  ;;  %v366_v17 = vld [vmem:[%s1769_s26 + $0xc] sm:$0xf]  ;;  %347 = vst.msk [vmem:[#allocation2 + $0x8] sm:$0xff] %vm345_vm2, %v1523_v18  ;;  %346 = vst.msk [vmem:[#allocation2] sm:$0xff] %vm345_vm2, %v1523_v18 }
  0x7f   : > { %v1150_v6 = vld [vmem:[%s339_s9] ss:$0 sm:$0xff]  ;;  %v1152_v9 = vld [vmem:[%s339_s9 + $0x2] ss:$0 sm:$0xff]  ;;  %v1151_v10 = vld [vmem:[%s339_s9 + $0x1] ss:$0 sm:$0xff] }
  0x80   : > { %581 = vperm.xlu0 %1311, %v1150_v6   ;;  %589 = vperm.xlu1 %1312, %v1152_v9   ;;  %v1153_v15 = vld [vmem:[%s339_s9 + $0x3] ss:$0 sm:$0xff]  ;;  %348 = vst.msk [vmem:[#allocation2 + $0x10] sm:$0xff] %vm345_vm2, %v1523_v18  ;;  %349 = vst.msk [vmem:[#allocation2 + $0x18] sm:$0xff] %vm345_vm2, %v1523_v18  ;;  %s297_s5 = scalar_lea.vmem [#allocation10], %s1765_s14  ;;  %vm728_vm3 = vcmask 1043456  }
  0x81   : > { %350 = vst.msk [vmem:[#allocation3] sm:$0xff] %vm345_vm2, %v1520_v0  ;;  %351 = vst.msk [vmem:[#allocation3 + $0x8] sm:$0xff] %vm345_vm2, %v1520_v0  ;;  %v371_v63 = vld [vmem:[%s297_s5] sm:$0xf]  ;;  %v372_v1 = vld [vmem:[%s297_s5 + $0x4] sm:$0xf] }
  0x82   : > { %352 = vst.msk [vmem:[#allocation3 + $0x10] sm:$0xff] %vm345_vm2, %v1520_v0  ;;  %353 = vst.msk [vmem:[#allocation3 + $0x18] sm:$0xff] %vm345_vm2, %v1520_v0  ;;  %v730_v2 = vsel %vm728_vm3, %v371_v63, 0  ;;  %v776_v3 = vsel %vm728_vm3, %v372_v1, 0  ;;  %v373_v4 = vld [vmem:[%s297_s5 + $0x8] sm:$0xf] }
  0x83   : > { %v822_v5 = vsel %vm728_vm3, %v373_v4, 0  ;;  %v374_v6 = vld [vmem:[%s297_s5 + $0xc] sm:$0xf]  ;;  %s1144_s7 = sshll.u32 %s1762_s25, 5  ;;  %s1166_s20 = sshll.u32 %s1505_s18, 9 }
  0x84   : > { %585 = vperm.xlu0 %1311, %v1151_v10   ;;  %1186 = vmatmul.mubr.msk.bf16.vlgmr.msra.gmra.mrb[0].mxu0 %vm354_vm0, %v363_v11  ;;  %v868_v7 = vsel %vm728_vm3, %v374_v6, 0  ;;  %v694_v1 = vld [vmem:[#allocation4 + $0x8] sm:$0xff]  ;;  %s335_s11 = scalar_lea.vmem [#allocation11], %s1144_s7  ;;  %s1903_s6 = scalar_lea.hbm %s1957_s4, %s1166_s20 }
  0x85   : > { %1192 = vmatmul.mubr.msk.bf16.vlgmr.msra.gmra.mrb[0].mxu1 %vm354_vm0, %v364_v12  ;;  %1196 = vmatpush3.bf16.xpose.msra.mxu0 %v472_v13  ;;  %v1852_v47 = vld [vmem:[#allocation2 + $0x8] sm:$0xff]  ;;  %v600_v48 = vld [vmem:[#allocation2] sm:$0xff]  ;;  %s980_s12 = sshll.u32 %s335_s11, 4  ;;  %s966_s10 = scalar_lea.sflag [#allocation7], %s1762_s25  ;;  %s1897_s12 = int_to_ptr.vmem [resolvable:$true] %s980_s12 }
  0x86   : > { %1202 = vmatpush3.bf16.xpose.msra.mxu1 %v518_v14  ;;  %1197 = vmatprep.mubr.msk.bf16.mxu0 %vm1521_vm1, %v1520_v0  ;;  %s1427_s14 = scalar_lea.vmem %s1897_s12, 512  ;;  %p1989_p8 = scmp.ne.s32.totalorder %s1975_s28, 0 }
  0x87   : > { %1203 = vmatprep.mubr.msk.bf16.mxu1 %vm1521_vm1, %v1520_v0  ;;  %593 = vperm.xlu1 %1312, %v1153_v15   ;;  %v602_v55 = vld [vmem:[#allocation2 + $0x10] sm:$0xff]  ;;  %v603_v58 = vld [vmem:[#allocation2 + $0x18] sm:$0xff]  ;;  %p1428_p10 = scmp.ne.s32.totalorder %s1897_s12, %s1427_s14  ;;  %s1524_s18 = smov [#allocation11]  }
  0x88   : > { %1207 = vmatprep.subr.bf16.mxu0 %v1520_v0  ;;  %1213 = vmatprep.subr.bf16.mxu1 %v1520_v0  ;;  %s1431_s8 = sshll.u32 %s1524_s18, 4  ;;  %s1432_s8 = int_to_ptr.vmem [resolvable:$false] %s1431_s8 }
  0x89   : > { %p1429_p9 = pnand %p1428_p10, %p1989_p8  ;;  %s1433_s26 = scalar_lea.vmem %s1432_s8, 1024 }
  0x8a   : > { %p1434_p1 = scmp.lt.s32.totalorder %s1897_s12, %s1432_s8  ;;  %p1435_p6 = scmp.lt.s32.totalorder %s1433_s26, %s1427_s14 }
  0x8b   : > { %p1430_p12 = pneg %p1429_p9 }
  0x8c   : > { %1198 = vmatmul.mubr.msk.bf16.vlgmr.msra.gmra.mrb[4].mxu0 %vm354_vm0, %v365_v16  ;;  %p1436_p13 = por %p1435_p6, %p1434_p1 }
  0x8d   : > { %1204 = vmatmul.mubr.msk.bf16.vlgmr.msra.gmra.mrb[4].mxu1 %vm354_vm0, %v366_v17  ;;  %1209 = vmatprep.mubr.msk.bf16.mxu0 %vm1521_vm1, %v1520_v0 }
  0x8e   : > { %1215 = vmatprep.mubr.msk.bf16.mxu1 %vm1521_vm1, %v1520_v0  ;;  %1208 = vmatpush3.bf16.msra.mxu0 %v730_v2  ;;  %p1437_p11 = pnand %p1436_p13, %p1430_p12 }
  0x8f   : > { %1214 = vmatpush3.bf16.msra.mxu1 %v776_v3  ;;  %1219 = vmatprep.subr.bf16.mxu0 %v1520_v0  ;;  %v693_v3 = vld [vmem:[#allocation4] sm:$0xff] }
  0x90   : > { %1225 = vmatprep.subr.bf16.mxu1 %v1520_v0 }
  0xff   : > { %v582_v19 = vpop.permute.xlu0 %581  ;;  %v590_v21 = vpop.permute.xlu1 %589 }
 0x103   : > { %v586_v20 = vpop.permute.xlu0 %585 }
 0x106   : > { %v594_v34 = vpop.permute.xlu1 %593 }
 0x157   : > { %v416_v22 = vpop.f32.mrb[0].mxu0 }
 0x158   : > { %v462_v23 = vpop.f32.mrb[0].mxu1  ;;  %v1842_v24 = vmul.f32 %v582_v19, %v416_v22  ;;  %v1187_v26 = vpop.f32.mrb[1].mxu0 }
 0x159   : > { %v1844_v25 = vmul.f32 %v586_v20, %v462_v23  ;;  %v1193_v27 = vpop.f32.mrb[1].mxu1  ;;  %v419_v28 = vpop.f32.mrb[2].mxu0 }
 0x15a   : > { %v465_v29 = vpop.f32.mrb[2].mxu1  ;;  %v1188_v30 = vpop.f32.mrb[3].mxu0  ;;  %v604_v31 = vsel %vm354_vm0, %v1842_v24, -inf }
 0x15b   : > { %v607_v32 = vsel %vm354_vm0, %v1844_v25, -inf  ;;  %v1194_v33 = vpop.f32.mrb[3].mxu1  ;;  %605 = vmax.xlane.f32.xlu0 %v604_v31 }
 0x15c   : > { %608 = vmax.xlane.f32.xlu1 %v607_v32 }
 0x15f   : > { %v508_v35 = vpop.f32.mrb[4].mxu0 }
 0x160   : > { %v554_v36 = vpop.f32.mrb[4].mxu1  ;;  %v598_v37 = vmul.f32 %v590_v21, %v508_v35  ;;  %v1199_v38 = vpop.f32.mrb[5].mxu0 }
 0x161   : > { %v1205_v39 = vpop.f32.mrb[5].mxu1  ;;  %v511_v40 = vpop.f32.mrb[6].mxu0  ;;  %v599_v42 = vmul.f32 %v594_v34, %v554_v36 }
 0x162   : > { %v557_v41 = vpop.f32.mrb[6].mxu1  ;;  %v1200_v43 = vpop.f32.mrb[7].mxu0  ;;  %v610_v44 = vsel %vm354_vm0, %v598_v37, -inf  ;;  %v665_v39 = vld [vmem:[#allocation3 + $0x8] sm:$0xff]  ;;  %v664_v40 = vld [vmem:[#allocation3] sm:$0xff] }
 0x163   : > { %v1206_v45 = vpop.f32.mrb[7].mxu1  ;;  %611 = vmax.xlane.f32.xlu0 %v610_v44  ;;  %v613_v46 = vsel %vm354_vm0, %v599_v42, -inf }
 0x167   : > { %614 = vmax.xlane.f32.xlu0 %v613_v46 }
 0x1e8   : > { %v606_v50 = vpop.xlane.xlu0 %605 }
 0x1e9   : > { %v609_v49 = vpop.xlane.xlu1 %608  ;;  %v616_v52 = vmax.f32 %v600_v48, %v606_v50  ;;  %v667_v50 = vld [vmem:[#allocation3 + $0x18] sm:$0xff] }
 0x1ea   : > { %v1855_v51 = vmax.f32 %v1852_v47, %v609_v49 }
 0x1eb   : > { %v620_v54 = vsub.f32 %v600_v48, %v616_v52  ;;  %918 = vst.msk [vmem:[#allocation2] sm:$0xff] %vm345_vm2, %v616_v52  ;;  %634 = vperm.xlu1 %1312, %v616_v52  }
 0x1ec   : > { %v621_v53 = vsub.f32 %v1852_v47, %v1855_v51  ;;  %919 = vst.msk [vmem:[#allocation2 + $0x8] sm:$0xff] %vm345_vm2, %v1855_v51  ;;  %639 = vperm.xlu0 %1311, %v1855_v51   ;;  %v666_v47 = vld [vmem:[#allocation3 + $0x10] sm:$0xff] }
 0x1ed   : > { %v624_v26 = vmul.f32 1.442695, %v620_v54 }
 0x1ee   : > { %v626_v35 = vmul.f32 1.442695, %v621_v53 }
 0x1f0   : > { %v612_v56 = vpop.xlane.xlu0 %611 }
 0x1f1   : > { %v618_v57 = vmax.f32 %v602_v55, %v612_v56 }
 0x1f3   : > { %v622_v59 = vsub.f32 %v602_v55, %v618_v57  ;;  %920 = vst.msk [vmem:[#allocation2 + $0x10] sm:$0xff] %vm345_vm2, %v618_v57  ;;  %644 = vperm.xlu1 %1312, %v618_v57  }
 0x1f4   : > { %v615_v60 = vpop.xlane.xlu0 %614 }
 0x1f5   : > { %v619_v61 = vmax.f32 %v603_v58, %v615_v60  ;;  %v628_v28 = vmul.f32 1.442695, %v622_v59 }
 0x1f7   : > { %v623_v62 = vsub.f32 %v603_v58, %v619_v61  ;;  %921 = vst.msk [vmem:[#allocation2 + $0x18] sm:$0xff] %vm345_vm2, %v619_v61  ;;  %649 = vperm.xlu1 %1312, %v619_v61  }
 0x1f9   : > { %v630_v32 = vmul.f32 1.442695, %v623_v62 }
 0x26a   : > { %v635_v9 = vpop.permute.xlu1 %634 }
 0x26b   : > { %v640_v8 = vpop.permute.xlu0 %639  ;;  %v652_v11 = vsub.f32 %v1842_v24, %v635_v9 }
 0x26c   : > { %v653_v10 = vsub.f32 %v1844_v25, %v640_v8 }
 0x26d   : > { %v656_v13 = vmul.f32 1.442695, %v652_v11 }
 0x26e   : > { %v658_v12 = vmul.f32 1.442695, %v653_v10 }
 0x270   : > { %1313 = vpow2.f32 %v658_v12 }
 0x271   : > { %1315 = vpow2.f32 %v656_v13 }
 0x272   : > { %v645_v14 = vpop.permute.xlu1 %644 }
 0x273   : > { %v654_v15 = vsub.f32 %v598_v37, %v645_v14 }
 0x275   : > { %v660_v16 = vmul.f32 1.442695, %v654_v15 }
 0x276   : > { %v650_v17 = vpop.permute.xlu1 %649 }
 0x277   : > { %1317 = vpow2.f32 %v660_v16  ;;  %v655_v18 = vsub.f32 %v599_v42, %v650_v17  ;;  %v695_v17 = vld [vmem:[#allocation4 + $0x10] sm:$0xff] }
 0x279   : > { %v662_v20 = vmul.f32 1.442695, %v655_v18 }
 0x27a   : > { %v1314_v19 = vpop.eup %1313 }
 0x27b   : > { %v1316_v21 = vpop.eup %1315  ;;  %v675_v22 = vsel %vm354_vm0, %v1314_v19, 0.0  ;;  %v722_v23 = vpack.c.bf16 %v1314_v19, %v1314_v19  ;;  %1319 = vpow2.f32 %v662_v20  ;;  %v696_v19 = vld [vmem:[#allocation4 + $0x18] sm:$0xff] }
 0x27c   : > { %676 = vadd.xlane.f32.xlu1 %v675_v22  ;;  %v672_v24 = vsel %vm354_vm0, %v1316_v21, 0.0  ;;  %v721_v25 = vpack.c.bf16 %v1316_v21, %v1316_v21  ;;  %1321 = vpow2.f32 %v624_v26 }
 0x27d   : > { %673 = vadd.xlane.f32.xlu0 %v672_v24  ;;  %1216 = vmatmul.mubr.msk.bf16.vlgmr.msra.gmra.mrb[8].mxu1 %vm354_vm0, %v722_v23  ;;  %1323 = vpow2.f32 %v628_v28 }
 0x27e   : > { %1210 = vmatmul.mubr.msk.bf16.vlgmr.msra.gmra.mrb[8].mxu0 %vm354_vm0, %v721_v25  ;;  %1226 = vmatpush3.bf16.msra.mxu1 %v868_v7  ;;  %1325 = vpow2.f32 %v630_v32 }
 0x27f   : > { %1220 = vmatpush3.bf16.msra.mxu0 %v822_v5  ;;  %1221 = vmatprep.mubr.msk.bf16.mxu0 %vm1521_vm1, %v1520_v0  ;;  %1327 = vpow2.f32 %v626_v35 }
 0x280   : > { %1227 = vmatprep.mubr.msk.bf16.mxu1 %vm1521_vm1, %v1520_v0 }
 0x281   : > { %v1318_v27 = vpop.eup %1317 }
 0x282   : > { %v678_v29 = vsel %vm354_vm0, %v1318_v27, 0.0  ;;  %v723_v30 = vpack.c.bf16 %v1318_v27, %v1318_v27 }
 0x283   : > { %679 = vadd.xlane.f32.xlu0 %v678_v29 }
 0x285   : > { %v1320_v31 = vpop.eup %1319 }
 0x286   : > { %1222 = vmatmul.mubr.msk.bf16.vlgmr.msra.gmra.mrb[12].mxu0 %vm354_vm0, %v723_v30  ;;  %v681_v33 = vsel %vm354_vm0, %v1320_v31, 0.0  ;;  %v724_v34 = vpack.c.bf16 %v1320_v31, %v1320_v31  ;;  %v1322_v0 = vpop.eup %1321 }
 0x287   : > { %682 = vadd.xlane.f32.xlu0 %v681_v33  ;;  %v1324_v36 = vpop.eup %1323  ;;  %v668_v42 = vmul.f32 %v1322_v0, %v664_v40 }
 0x288   : > { %1228 = vmatmul.mubr.msk.bf16.vlgmr.msra.gmra.mrb[12].mxu1 %vm354_vm0, %v724_v34  ;;  %v1326_v37 = vpop.eup %1325  ;;  %v670_v48 = vmul.f32 %v1324_v36, %v666_v47 }
 0x289   : > { %v1328_v38 = vpop.eup %1327  ;;  %v671_v53 = vmul.f32 %v1326_v37, %v667_v50 }
 0x28a   : > { %v669_v41 = vmul.f32 %v1328_v38, %v665_v39 }
 0x28d   : > { %699 = vperm.xlu1 %1312, %v1322_v0  }
 0x291   : > { %709 = vperm.xlu1 %1312, %v1324_v36  }
 0x295   : > { %714 = vperm.xlu1 %1312, %v1326_v37  }
 0x29d   : > { %704 = vperm.xlu0 %1311, %v1328_v38  }
 0x309   : > { %v677_v43 = vpop.xlane.xlu1 %676 }
 0x30a   : > { %v674_v44 = vpop.xlane.xlu0 %673  ;;  %v685_v45 = vadd.f32 %v677_v43, %v669_v41 }
 0x30b   : > { %v684_v46 = vadd.f32 %v674_v44, %v668_v42 }
 0x30c   : > { %690 = vst.msk [vmem:[#allocation3 + $0x8] sm:$0xff] %vm345_vm2, %v685_v45 }
 0x30d   : > { %689 = vst.msk [vmem:[#allocation3] sm:$0xff] %vm345_vm2, %v684_v46  ;;  %v700_v63 = vpop.permute.xlu1 %699 }
 0x30e   : > { %v717_v5 = vmul.f32 %v700_v63, %v693_v3 }
 0x310   : > { %v680_v49 = vpop.xlane.xlu0 %679 }
 0x311   : > { %v686_v51 = vadd.f32 %v680_v49, %v670_v48  ;;  %v710_v6 = vpop.permute.xlu1 %709 }
 0x312   : > { %v719_v18 = vmul.f32 %v710_v6, %v695_v17 }
 0x313   : > { %v926_v52 = vld [vmem:[#allocation3 + $0x8] sm:$0xff]  ;;  %691 = vst.msk [vmem:[#allocation3 + $0x10] sm:$0xff] %vm345_vm2, %v686_v51 }
 0x314   : > { %1329 = vrcp.f32 %v926_v52  ;;  %v925_v54 = vld [vmem:[#allocation3] sm:$0xff]  ;;  %v683_v55 = vpop.xlane.xlu0 %682 }
 0x315   : > { %1331 = vrcp.f32 %v925_v54  ;;  %v687_v56 = vadd.f32 %v683_v55, %v671_v53  ;;  %v715_v20 = vpop.permute.xlu1 %714 }
 0x316   : > { %v720_v24 = vmul.f32 %v715_v20, %v696_v19 }
 0x317   : > { %692 = vst.msk [vmem:[#allocation3 + $0x18] sm:$0xff] %vm345_vm2, %v687_v56 }
 0x31a   : > { %v927_v57 = vld [vmem:[#allocation3 + $0x10] sm:$0xff] }
 0x31b   : > { %1333 = vrcp.f32 %v927_v57 }
 0x31c   : > { %v705_v2 = vpop.permute.xlu0 %704 }
 0x31d   : > { %v718_v4 = vmul.f32 %v705_v2, %v694_v1 }
 0x31e   : > { %v1330_v58 = vpop.eup %1329  ;;  %v928_v60 = vld [vmem:[#allocation3 + $0x18] sm:$0xff] }
 0x31f   : > { %v1332_v59 = vpop.eup %1331  ;;  %944 = vperm.xlu1 %1312, %v1330_v58   ;;  %1335 = vrcp.f32 %v928_v60 }
 0x320   : > { %939 = vperm.xlu0 %1311, %v1332_v59  }
 0x325   : > { %v1334_v61 = vpop.eup %1333 }
 0x326   : > { %949 = vperm.xlu0 %1311, %v1334_v61  }
 0x329   : > { %v1336_v62 = vpop.eup %1335 }
 0x32a   : > { %954 = vperm.xlu1 %1312, %v1336_v62  }
 0x350   : > { %v812_v7 = vpop.f32.mrb[8].mxu1 }
 0x351   : > { %v766_v8 = vpop.f32.mrb[8].mxu0  ;;  %v911_v9 = vadd.f32 %v812_v7, %v718_v4  ;;  %v1217_v10 = vpop.f32.mrb[9].mxu1 }
 0x352   : > { %v910_v11 = vadd.f32 %v766_v8, %v717_v5  ;;  %v1211_v12 = vpop.f32.mrb[9].mxu0  ;;  %v815_v13 = vpop.f32.mrb[10].mxu1 }
 0x353   : > { %915 = vst.msk [vmem:[#allocation4 + $0x8] sm:$0xff] %vm354_vm0, %v911_v9  ;;  %v769_v14 = vpop.f32.mrb[10].mxu0  ;;  %v1218_v15 = vpop.f32.mrb[11].mxu1 }
 0x354   : > { %914 = vst.msk [vmem:[#allocation4] sm:$0xff] %vm354_vm0, %v910_v11  ;;  %v1212_v16 = vpop.f32.mrb[11].mxu0 }
 0x359   : > { %v858_v21 = vpop.f32.mrb[12].mxu0 }
 0x35a   : > { %v912_v22 = vadd.f32 %v858_v21, %v719_v18  ;;  %v1223_v23 = vpop.f32.mrb[13].mxu0  ;;  %v934_v32 = vld [vmem:[#allocation4 + $0x8] sm:$0xff] }
 0x35b   : > { %v861_v25 = vpop.f32.mrb[14].mxu0  ;;  %v904_v27 = vpop.f32.mrb[12].mxu1  ;;  %v933_v0 = vld [vmem:[#allocation4] sm:$0xff] }
 0x35c   : > { %916 = vst.msk [vmem:[#allocation4 + $0x10] sm:$0xff] %vm354_vm0, %v912_v22  ;;  %v1224_v26 = vpop.f32.mrb[15].mxu0  ;;  %v913_v28 = vadd.f32 %v904_v27, %v720_v24  ;;  %v1229_v29 = vpop.f32.mrb[13].mxu1 }
 0x35d   : > { %v907_v30 = vpop.f32.mrb[14].mxu1 }
 0x35e   : > { %917 = vst.msk [vmem:[#allocation4 + $0x18] sm:$0xff] %vm354_vm0, %v913_v28  ;;  %v1230_v31 = vpop.f32.mrb[15].mxu1 }
 0x363   : > { %v935_v37 = vld [vmem:[#allocation4 + $0x10] sm:$0xff] }
 0x365   : > { %v936_v40 = vld [vmem:[#allocation4 + $0x18] sm:$0xff] }
 0x39e   : > { %v945_v33 = vpop.permute.xlu1 %944 }
 0x39f   : > { %v958_v34 = vmul.f32 %v945_v33, %v934_v32  ;;  %v940_v35 = vpop.permute.xlu0 %939 }
 0x3a0   : > { %v957_v36 = vmul.f32 %v940_v35, %v933_v0 }
 0x3a1   : > { %962 = vst.msk [vmem:[%s335_s11 + $0x8] sm:$0xff] %vm354_vm0, %v958_v34 }
 0x3a2   : > { %961 = vst.msk [vmem:[%s335_s11] sm:$0xff] %vm354_vm0, %v957_v36 }
 0x3a5   : > { %v950_v38 = vpop.permute.xlu0 %949 }
 0x3a6   : > { %v959_v39 = vmul.f32 %v950_v38, %v935_v37 }
 0x3a8   : > { %963 = vst.msk [vmem:[%s335_s11 + $0x10] sm:$0xff] %vm354_vm0, %v959_v39 }
 0x3a9   : > { %v955_v41 = vpop.permute.xlu1 %954 }
 0x3aa   : > { %v960_v42 = vmul.f32 %v955_v41, %v936_v40 }
 0x3ac   : > { %964 = vst.msk [vmem:[%s335_s11 + $0x18] sm:$0xff] %vm354_vm0, %v960_v42 }
 0x3ad   : > { %1440 = shalt.err (!%p1437_p11)
}
 0x3ae   : > { %s1441_s22 = scalar_lea.hbm %s1903_s6, 512  ;;  %s1445_s21 = scalar_lea.hbm %s1957_s4, 1024 }
 0x3af   : > { %p1442_p2 = scmp.ne.s32.totalorder %s1903_s6, %s1441_s22  ;;  %p1446_p4 = scmp.lt.u32.totalorder %s1903_s6, %s1957_s4 }
 0x3b0   : > { %p1447_p3 = scmp.lt.u32.totalorder %s1445_s21, %s1441_s22  ;;  %p1449_p10 = scmp.lt.u32.totalorder %s1441_s22, %s1903_s6 }
 0x3b1   : > { %p1443_p5 = pnand %p1442_p2, %p1989_p8 }
 0x3b2   : > { %p1448_p0 = por %p1447_p3, %p1446_p4 }
 0x3b3   : > { %p1444_p7 = pneg %p1443_p5 }
 0x3b4   : > { %p1450_p9 = por %p1449_p10, %p1448_p0 }
 0x3b6   : > { %p1451_p12 = pnand %p1450_p9, %p1444_p7 }
 0x3b8   : > { %1454 = shalt.err (!%p1451_p12)
}
 0x3b9   : > { %s1525_s29 = smov 128   ;;  %s1526_s9 = smov 8  }
 0x3ba   : > { %1237 = dma.vmem_to_hbm [thread:$0]  (%p1989_p8), %s1897_s12, 512, %s1903_s6, %s966_s10, %s1525_s29, %s1525_s29, %s1526_s9  }
 0x3bb PF: > { %s1990_s5 = sld [smem:[#allocation16_spill]]  ;;  %s995_s7 = sand.u32 1, %s1493_s15  }
 0x3bc   : > { %p1991_p1 = scmp.ne.s32.totalorder %s1977_s30, 0  ;;  %s996_s11 = scalar_lea.sflag [#allocation7], %s995_s7 }
 0x3c1   : > { %p1992_p6 = scmp.ge.s32.totalorder %s1990_s5, 2 }
 0x3c3   : > { %p1250_p13 = pnand %p1992_p6, %p1991_p1 }
 0x3c5   : > { %1488 = dma.done.wait (!%p1250_p13), %s996_s11, 512  }
 0x3c6   : > { %1490 = vsyncadd (!%p1250_p13), %s996_s11, 4294966784  ;;  %s23_s20 = sadd.s32 1, %s1990_s5   ;;  %s1993_s2 = sld [smem:[#allocation18_spill]] }
 0x3c7   : > { %p20_p11 = scmp.ge.s32.totalorder %s23_s20, 4   ;;  %s1994_s18 = sld [smem:[#allocation15_spill]] }
 0x3c8   : > { %s1995_s19 = sld [smem:[#allocation17_spill]]  ;;  %s1996_s15 = smov %s1497_s16 }
 0x3c9   : > { %s1997_s16 = smov %s1501_s17  ;;  %22 = sbr.rel (!%p20_p11) target bundleno = 10 (0xa), region = 116 }
 0x3cc   : > { %s1998_s17 = smov %s1993_s2 }
 0x3d0   :  { %1001 = vsyncpa [#allocation6], 1 }
 0x3d1   :  { %1003 = vsyncpa [#allocation6 + $0x1], 1 }
 0x3d2   :  { %1004 = vsyncpa [#allocation9], 1 }
 0x3d3   :  { %1006 = vsyncpa [#allocation9 + $0x1], 1 }
 0x3d4   :  { %1007 = vsyncpa [#allocation7], 1 }
 0x3d5   :  { %1009 = vsyncpa [#allocation7 + $0x1], 1 }

</bundles_post_ra>
